<compile_context>
chip_gen: v6e
topology: v6e:2x2x1
jax: 0.10.0
libtpu: 0.0.40
codegen_flags: <defaults>
</compile_context>

<pallas_src>
import jax
import jax.numpy as jnp
from jax.experimental import pallas as pl
from jax.experimental.pallas import tpu as pltpu


def _round_up(x: int, m: int) -> int:
    return ((x + m - 1) // m) * m


def _decoder_kernel(z_ref, w1_ref, b1_ref, w2_ref, b2_ref, out_ref):
    # fc1: (TB, Z) @ (Z, Hp) + (1, Hp)  -- bf16 inputs, f32 accumulation.
    h_pre = jnp.dot(z_ref[...], w1_ref[...],
                    preferred_element_type=jnp.float32) + b1_ref[...]
    # Numerically stable softplus: max(x, 0) + log1p(exp(-|x|)).
    hidden = jnp.maximum(h_pre, 0.0) + jnp.log1p(jnp.exp(-jnp.abs(h_pre)))
    # fc21: (TB, Hp) @ (Hp, 784) + (1, 784).  Padded W2 rows are exact zeros,
    # so padded hidden lanes (softplus(0) = log 2) contribute nothing.
    o_pre = jnp.dot(hidden.astype(jnp.bfloat16), w2_ref[...],
                    preferred_element_type=jnp.float32) + b2_ref[...]
    # Sigmoid via tanh -> single EUP transcendental, no vector divide.
    out_ref[...] = 0.5 * (jnp.tanh(0.5 * o_pre) + 1.0)


def prepare_decoder_params(w1, b1, w2, b2):
    """Pad once to lane-friendly shapes and cast matmul operands to bf16.

    Inputs are stored pre-transposed as (in_features, out_features):
      w1: (z_dim, hidden), b1: (1, hidden), w2: (hidden, 784), b2: (1, 784).
    """
    hidden_dim = w1.shape[1]
    h_pad = _round_up(hidden_dim, 128)
    # Pad with exact zeros in f32 FIRST, then cast to bf16 (keeps the padded
    # W2 rows exactly zero, which is what neutralizes softplus(0) = log 2).
    w1p = jnp.pad(w1.astype(jnp.float32),
                  ((0, 0), (0, h_pad - hidden_dim))).astype(jnp.bfloat16)
    b1p = jnp.pad(b1.astype(jnp.float32), ((0, 0), (0, h_pad - hidden_dim)))
    w2p = jnp.pad(w2.astype(jnp.float32),
                  ((0, h_pad - hidden_dim), (0, 0))).astype(jnp.bfloat16)
    b2p = b2.astype(jnp.float32)
    return w1p, b1p, w2p, b2p


def decoder_forward(z, w1p, b1p, w2p, b2p, *, block_b: int = 1024):
    """z: (B, z_dim); prepared params from prepare_decoder_params().
    Returns (B, 784) float32 — no padded output, no post-kernel slice."""
    B, z_dim = z.shape
    h_pad = w1p.shape[1]
    out_dim = w2p.shape[1]          # 784; equals full last dim in BlockSpecs

    tb = min(block_b, _round_up(B, 8))   # batch tile, multiple of 8
    grid = (pl.cdiv(B, tb),)             # ragged last block handled by Pallas

    zb = z.astype(jnp.bfloat16)          # halve z HBM traffic into the kernel

    return pl.pallas_call(
        _decoder_kernel,
        out_shape=jax.ShapeDtypeStruct((B, out_dim), jnp.float32),
        grid_spec=pltpu.PrefetchScalarGridSpec(
            num_scalar_prefetch=0,
            grid=grid,
            in_specs=[
                pl.BlockSpec((tb, z_dim), lambda i: (i, 0)),       # streamed
                pl.BlockSpec((z_dim, h_pad), lambda i: (0, 0)),    # resident
                pl.BlockSpec((1, h_pad), lambda i: (0, 0)),        # resident
                pl.BlockSpec((h_pad, out_dim), lambda i: (0, 0)),  # resident
                pl.BlockSpec((1, out_dim), lambda i: (0, 0)),      # resident
            ],
            out_specs=pl.BlockSpec((tb, out_dim), lambda i: (i, 0)),
        ),
        compiler_params=pltpu.CompilerParams(
            dimension_semantics=("parallel",),   # feeds both v7x TCs
        ),
    )(zb, w1p, b1p, w2p, b2p)


def init_decoder_params(key, z_dim, hidden_dim, out_dim=784):
    """Deterministic init mimicking PyTorch nn.Linear default:
    U(-1/sqrt(fan_in), 1/sqrt(fan_in)). Weights stored as (in, out)."""
    k1, k2, k3, k4 = jax.random.split(key, 4)
    bound1 = 1.0 / jnp.sqrt(z_dim)
    bound2 = 1.0 / jnp.sqrt(hidden_dim)
    w1 = jax.random.uniform(k1, (z_dim, hidden_dim), jnp.float32, -bound1, bound1)
    b1 = jax.random.uniform(k2, (1, hidden_dim), jnp.float32, -bound1, bound1)
    w2 = jax.random.uniform(k3, (hidden_dim, out_dim), jnp.float32, -bound2, bound2)
    b2 = jax.random.uniform(k4, (1, out_dim), jnp.float32, -bound2, bound2)
    return w1, b1, w2, b2


def _reference_forward(z, w1, b1, w2, b2):
    h = jax.nn.softplus(z @ w1 + b1)
    return jax.nn.sigmoid(h @ w2 + b2)


if __name__ == "__main__":
    key = jax.random.PRNGKey(0)
    z_dim, hidden_dim, batch = 8, 32, 2

    kz, kp = jax.random.split(key)
    z = jax.random.normal(kz, (batch, z_dim), dtype=jnp.float32)
    w1, b1, w2, b2 = init_decoder_params(kp, z_dim, hidden_dim)
    w1p, b1p, w2p, b2p = prepare_decoder_params(w1, b1, w2, b2)

    out = jax.block_until_ready(decoder_forward(z, w1p, b1p, w2p, b2p))
    ref = _reference_forward(z, w1, b1, w2, b2)
    assert out.shape == (batch, 784), out.shape
    # bf16 matmul inputs with f32 accumulation -> loosened tolerance.
    assert jnp.allclose(out, ref, atol=2e-2, rtol=2e-2), "mismatch vs reference"

    # Multi-tile batch (grid > 1, ragged last block) to exercise the
    # pipelined / masked-tail path.
    big_b = 1100
    zb = jax.random.normal(jax.random.PRNGKey(1), (big_b, z_dim), dtype=jnp.float32)
    out_big = jax.block_until_ready(decoder_forward(zb, w1p, b1p, w2p, b2p))
    ref_big = _reference_forward(zb, w1, b1, w2, b2)
    assert out_big.shape == (big_b, 784)
    assert jnp.allclose(out_big, ref_big, atol=2e-2, rtol=2e-2), "mismatch (batched)"

    print("KERNEL_OK")
</pallas_src>

<mosaic_0001>
module attributes {stable_mosaic.version = 11 : i64} {
  func.func @_decoder_kernel(%arg0: i32, %arg1: memref<8x8xbf16, #tpu.memory_space<vmem>>, %arg2: memref<8x128xbf16, #tpu.memory_space<vmem>>, %arg3: memref<1x128xf32, #tpu.memory_space<vmem>>, %arg4: memref<128x784xbf16, #tpu.memory_space<vmem>>, %arg5: memref<1x784xf32, #tpu.memory_space<vmem>>, %arg6: memref<8x784xf32, #tpu.memory_space<vmem>>) attributes {dimension_semantics = [#tpu.dimension_semantics<parallel>], iteration_bounds = array<i64: 1>, scalar_prefetch = 0 : i64, scratch_operands = 0 : i64, tpu.core_type = #tpu.core_type<tc>, window_params = [{transform_indices = @transform_0, window_bounds = array<i64: 8, 8>}, {pipeline_mode = #tpu.pipeline_mode<synchronous>, transform_indices = @transform_1, window_bounds = array<i64: 8, 128>}, {pipeline_mode = #tpu.pipeline_mode<synchronous>, transform_indices = @transform_2, window_bounds = array<i64: 1, 128>}, {pipeline_mode = #tpu.pipeline_mode<synchronous>, transform_indices = @transform_3, window_bounds = array<i64: 128, 784>}, {pipeline_mode = #tpu.pipeline_mode<synchronous>, transform_indices = @transform_4, window_bounds = array<i64: 1, 784>}, {transform_indices = @transform_5, window_bounds = array<i64: 8, 784>}]} {
    %c0 = arith.constant 0 : index
    %c0_0 = arith.constant 0 : index
    %0 = vector.load %arg1[%c0, %c0_0] : memref<8x8xbf16, #tpu.memory_space<vmem>>, vector<8x8xbf16>
    %c0_1 = arith.constant 0 : index
    %c0_2 = arith.constant 0 : index
    %1 = vector.load %arg2[%c0_1, %c0_2] : memref<8x128xbf16, #tpu.memory_space<vmem>>, vector<8x128xbf16>
    %cst = arith.constant dense<0.000000e+00> : vector<8x128xf32>
    %2 = tpu.matmul %0, %1, %cst {dimension_numbers = #tpu.dot_dimension_numbers<[1], [0], [0], [1], [0, 0, 1, 1], [], []>} : vector<8x8xbf16>, vector<8x128xbf16>, vector<8x128xf32> -> vector<8x128xf32>
    %c0_3 = arith.constant 0 : index
    %c0_4 = arith.constant 0 : index
    %3 = vector.load %arg3[%c0_3, %c0_4] : memref<1x128xf32, #tpu.memory_space<vmem>>, vector<1x128xf32>
    %4 = vector.broadcast %3 : vector<1x128xf32> to vector<8x128xf32>
    %5 = arith.addf %2, %4 : vector<8x128xf32>
    %cst_5 = arith.constant 0.000000e+00 : f32
    %6 = vector.broadcast %cst_5 : f32 to vector<8x128xf32>
    %7 = arith.maximumf %5, %6 : vector<8x128xf32>
    %8 = math.absf %5 : vector<8x128xf32>
    %cst_6 = arith.constant 0.000000e+00 : f32
    %9 = vector.broadcast %cst_6 : f32 to vector<8x128xf32>
    %10 = arith.subf %9, %8 : vector<8x128xf32>
    %11 = math.exp %10 : vector<8x128xf32>
    %12 = math.log1p %11 : vector<8x128xf32>
    %13 = arith.addf %7, %12 : vector<8x128xf32>
    %14 = arith.truncf %13 : vector<8x128xf32> to vector<8x128xbf16>
    %c0_7 = arith.constant 0 : index
    %c0_8 = arith.constant 0 : index
    %15 = vector.load %arg4[%c0_7, %c0_8] : memref<128x784xbf16, #tpu.memory_space<vmem>>, vector<128x784xbf16>
    %cst_9 = arith.constant dense<0.000000e+00> : vector<8x784xf32>
    %16 = tpu.matmul %14, %15, %cst_9 {dimension_numbers = #tpu.dot_dimension_numbers<[1], [0], [0], [1], [0, 0, 1, 1], [], []>} : vector<8x128xbf16>, vector<128x784xbf16>, vector<8x784xf32> -> vector<8x784xf32>
    %c0_10 = arith.constant 0 : index
    %c0_11 = arith.constant 0 : index
    %17 = vector.load %arg5[%c0_10, %c0_11] : memref<1x784xf32, #tpu.memory_space<vmem>>, vector<1x784xf32>
    %18 = vector.broadcast %17 : vector<1x784xf32> to vector<8x784xf32>
    %19 = arith.addf %16, %18 : vector<8x784xf32>
    %cst_12 = arith.constant 5.000000e-01 : f32
    %20 = vector.broadcast %cst_12 : f32 to vector<8x784xf32>
    %21 = arith.mulf %20, %19 : vector<8x784xf32>
    %22 = math.tanh %21 : vector<8x784xf32>
    %cst_13 = arith.constant 1.000000e+00 : f32
    %23 = vector.broadcast %cst_13 : f32 to vector<8x784xf32>
    %24 = arith.addf %22, %23 : vector<8x784xf32>
    %cst_14 = arith.constant 5.000000e-01 : f32
    %25 = vector.broadcast %cst_14 : f32 to vector<8x784xf32>
    %26 = arith.mulf %25, %24 : vector<8x784xf32>
    %c0_15 = arith.constant 0 : index
    %c0_16 = arith.constant 0 : index
    %27 = vector.load %arg6[%c0_15, %c0_16] : memref<8x784xf32, #tpu.memory_space<vmem>>, vector<8x784xf32>
    tpu.vector_store %arg6[%c0_15, %c0_16], %26 {strides = array<i32>} : memref<8x784xf32, #tpu.memory_space<vmem>>, vector<8x784xf32>,
    return
  }
  func.func @transform_0(%arg0: i32) -> (i32, i32) {
    %c0_i32 = arith.constant 0 : i32
    %c0_i32_0 = arith.constant 0 : i32
    return %arg0, %c0_i32 : i32, i32
  }
  func.func @transform_1(%arg0: i32) -> (i32, i32) {
    %c0_i32 = arith.constant 0 : i32
    %c0_i32_0 = arith.constant 0 : i32
    %c0_i32_1 = arith.constant 0 : i32
    return %c0_i32, %c0_i32_0 : i32, i32
  }
  func.func @transform_2(%arg0: i32) -> (i32, i32) {
    %c0_i32 = arith.constant 0 : i32
    %c0_i32_0 = arith.constant 0 : i32
    %c0_i32_1 = arith.constant 0 : i32
    return %c0_i32, %c0_i32_0 : i32, i32
  }
  func.func @transform_3(%arg0: i32) -> (i32, i32) {
    %c0_i32 = arith.constant 0 : i32
    %c0_i32_0 = arith.constant 0 : i32
    %c0_i32_1 = arith.constant 0 : i32
    return %c0_i32, %c0_i32_0 : i32, i32
  }
  func.func @transform_4(%arg0: i32) -> (i32, i32) {
    %c0_i32 = arith.constant 0 : i32
    %c0_i32_0 = arith.constant 0 : i32
    %c0_i32_1 = arith.constant 0 : i32
    return %c0_i32, %c0_i32_0 : i32, i32
  }
  func.func @transform_5(%arg0: i32) -> (i32, i32) {
    %c0_i32 = arith.constant 0 : i32
    %c0_i32_0 = arith.constant 0 : i32
    return %arg0, %c0_i32 : i32, i32
  }
}

</mosaic_0001>

<bundles_post_ra>
// kernel: tpu_custom_call.1
= control target key start
LH: loop header
LB: loop body
LE: loop exit
PB: predicated region body
PF: predicated region fallthrough
CT: control target
= control target key end

     0   :  { %10 = vsyncpa [#allocation3], 0  ;;  %vm66_vm0 = vcmask 1043456   ;;  %v43_v1 = vlaneseq  ;;  %v1044_v2 = vmov 0.0   ;;  %vm1045_vm1 = vmmov 0   ;;  %s1298_s0 = inlined_call_operand.vmem [shape: bf16[2,8], index: 0, kind: input, shape index: {}]   ;;  %s1299_s1 = inlined_call_operand.vmem [shape: bf16[8,128], index: 1, kind: input, shape index: {}]   ;;  %s1300_s2 = inlined_call_operand.vmem [shape: f32[1,128], index: 2, kind: input, shape index: {}]   ;;  %s1301_s3 = inlined_call_operand.vmem [shape: bf16[128,784], index: 3, kind: input, shape index: {}]   ;;  %s1302_s4 = inlined_call_operand.vmem [shape: f32[1,784], index: 4, kind: input, shape index: {}]   ;;  %s1303_s5 = inlined_call_operand.hbm [shape: f32[2,784], index: 5, kind: output, shape index: {}]  }
   0x1   :  { %v26_v0 = vld [vmem:[%s1299_s1] sm:$0xf]  ;;  %890 = vmatprep.subr.bf16.mxu0 %v1044_v2  ;;  %892 = vmatprep.mubr.msk.bf16.mxu0 %vm1045_vm1, %v1044_v2  ;;  %v1046_v8 = vmov 1966171168   ;;  %vm62_vm2 = vcmask 64512   ;;  %v1047_v52 = vmov 0  }
   0x2   :  { %v68_v3 = vsel %vm66_vm0, %v26_v0, 0  ;;  %v22_v4 = vld [vmem:[%s1298_s0] sm:$0x1]  ;;  %v23_v5 = vld [vmem:[%s1298_s0 + $0x1] sm:$0x1]  ;;  %v41_v9 = vunpack.c.l.s4 %v1046_v8  ;;  %v1100_v10 = vshrl.u32 %v43_v1, 7  ;;  %547 = vmatprep.mubr.bf16.mxu1 %v1047_v52 }
   0x3   :  { %891 = vmatpush3.bf16.msra.mxu0 %v68_v3  ;;  %v24_v6 = vld [vmem:[%s1298_s0 + $0x2] sm:$0x1]  ;;  %v25_v7 = vld [vmem:[%s1298_s0 + $0x3] sm:$0x1]  ;;  %v38_v11 = vcombine.low %v22_v4, %v23_v5  ;;  %v924_v19 = vld [vmem:[%s1301_s3 + $0x18c] ss:$28 sps:$4 sm:$0xff]  }
   0x4   :  { %v39_v12 = vcombine.low %v24_v6, %v25_v7  ;;  %v42_v13 = vunpack.c.0.s8 %v41_v9  ;;  %v928_v20 = vld [vmem:[%s1301_s3 + $0x194] ss:$28 sps:$4 sm:$0xff]   ;;  %v929_v22 = vld [vmem:[%s1301_s3 + $0x188] ss:$28 sps:$4 sm:$0xff]   ;;  %515 = vmatprep.subr.bf16.mxu1 %v924_v19  ;;  %v934_v24 = vld [vmem:[%s1301_s3 + $0x15c] ss:$28 sps:$4 sm:$0xff]  }
   0x5   :  { %v926_v21 = vld [vmem:[%s1301_s3 + $0x190] ss:$28 sps:$4 sm:$0xff]   ;;  %556 = vmatprep.subr.bf16.mxu0 %v928_v20  ;;  %516 = vmatpush1.bf16.msra.mxu1 %v929_v22  ;;  %v932_v25 = vld [vmem:[%s1301_s3 + $0x158] ss:$28 sps:$4 sm:$0xff]   ;;  %v940_v28 = vld [vmem:[%s1301_s3 + $0x124] ss:$28 sps:$4 sm:$0xff]  }
   0x6   :  { %v45_v14 = vsub.s32 %v42_v13, %v1100_v10  ;;  %v930_v23 = vld [vmem:[%s1301_s3 + $0x154] ss:$28 sps:$4 sm:$0xff]   ;;  %v936_v27 = vld [vmem:[%s1301_s3 + $0x11c] ss:$28 sps:$4 sm:$0xff]   ;;  %v942_v31 = vld [vmem:[%s1301_s3 + $0xe4] ss:$28 sps:$4 sm:$0xff]  }
   0x7   :  { %v935_v26 = vld [vmem:[%s1301_s3 + $0x150] ss:$28 sps:$4 sm:$0xff]   ;;  %517 = vmatprep.subr.bf16.mxu1 %v930_v23  ;;  %v938_v29 = vld [vmem:[%s1301_s3 + $0x120] ss:$28 sps:$4 sm:$0xff]   ;;  %v941_v30 = vld [vmem:[%s1301_s3 + $0x118] ss:$28 sps:$4 sm:$0xff]  }
   0x8   :  { %v46_v15 = vrot.slane %v38_v11, %v45_v14  ;;  %v53_v16 = vrot.slane %v39_v12, %v45_v14  ;;  %v946_v32 = vld [vmem:[%s1301_s3 + $0xec] ss:$28 sps:$4 sm:$0xff]   ;;  %v947_v34 = vld [vmem:[%s1301_s3 + $0xe0] ss:$28 sps:$4 sm:$0xff]   ;;  %v952_v36 = vld [vmem:[%s1301_s3 + $0xb4] ss:$28 sps:$4 sm:$0xff]  }
   0x9   :  { %518 = vmatpush1.bf16.msra.mxu1 %v935_v26  ;;  %v944_v33 = vld [vmem:[%s1301_s3 + $0xe8] ss:$28 sps:$4 sm:$0xff]   ;;  %v950_v37 = vld [vmem:[%s1301_s3 + $0xb0] ss:$28 sps:$4 sm:$0xff]   ;;  %v958_v40 = vld [vmem:[%s1301_s3 + $0x7c] ss:$28 sps:$4 sm:$0xff]  }
   0xa   :  { %v54_v17 = vcombine.low %v46_v15, %v53_v16  ;;  %519 = vmatprep.subr.bf16.mxu1 %v936_v27  ;;  %v948_v35 = vld [vmem:[%s1301_s3 + $0xac] ss:$28 sps:$4 sm:$0xff]   ;;  %v954_v39 = vld [vmem:[%s1301_s3 + $0x74] ss:$28 sps:$4 sm:$0xff]   ;;  %v960_v43 = vld [vmem:[%s1301_s3 + $0x3c] ss:$28 sps:$4 sm:$0xff]  }
   0xb   :  { %v953_v38 = vld [vmem:[%s1301_s3 + $0xa8] ss:$28 sps:$4 sm:$0xff]   ;;  %v956_v41 = vld [vmem:[%s1301_s3 + $0x78] ss:$28 sps:$4 sm:$0xff]   ;;  %v959_v42 = vld [vmem:[%s1301_s3 + $0x70] ss:$28 sps:$4 sm:$0xff]  }
   0xc   :  { %v61_v18 = vrot.slane %v54_v17, %v45_v14  ;;  %v964_v44 = vld [vmem:[%s1301_s3 + $0x44] ss:$28 sps:$4 sm:$0xff]   ;;  %v965_v46 = vld [vmem:[%s1301_s3 + $0x38] ss:$28 sps:$4 sm:$0xff]   ;;  %v970_v48 = vld [vmem:[%s1301_s3 + $0xc] ss:$28 sps:$4 sm:$0xff]  }
   0xd   :  { %520 = vmatpush1.bf16.msra.mxu1 %v941_v30  ;;  %v962_v45 = vld [vmem:[%s1301_s3 + $0x40] ss:$28 sps:$4 sm:$0xff]   ;;  %v968_v49 = vld [vmem:[%s1301_s3 + $0x8] ss:$28 sps:$4 sm:$0xff]   ;;  %v972_v11 = vld [vmem:[%s1301_s3 + $0x198] ss:$28 sps:$4 sm:$0xff]  }
   0xe   :  { %893 = vmatmul.mubr.msk.bf16.vlgmr.msra.gmra.mxu0 %vm62_vm2, %v61_v18  ;;  %521 = vmatprep.subr.bf16.mxu1 %v942_v31  ;;  %v966_v47 = vld [vmem:[%s1301_s3 + $0x4] ss:$28 sps:$4 sm:$0xff]   ;;  %v974_v51 = vld [vmem:[%s1301_s3 + $0x19c] ss:$28 sps:$4 sm:$0xff]   ;;  %v982_v17 = vld [vmem:[%s1301_s3 + $0x12c] ss:$28 sps:$4 sm:$0xff]  }
   0xf   :  { %557 = vmatpush1.bf16.msra.mxu0 %v926_v21  ;;  %v971_v50 = vld [vmem:[%s1301_s3] ss:$28 sps:$4 sm:$0xff]   ;;  %588 = vmatprep.mubr.bf16.mxu0 %v1047_v52  ;;  %v979_v16 = vld [vmem:[%s1301_s3 + $0x168] ss:$28 sps:$4 sm:$0xff]   ;;  %v983_v19 = vld [vmem:[%s1301_s3 + $0x130] ss:$28 sps:$4 sm:$0xff]  }
  0x10   :  { %558 = vmatprep.subr.bf16.mxu0 %v934_v24  ;;  %v821_v53 = vld [vmem:[%s1300_s2] ss:$0 sm:$0xff]  ;;  %v980_v18 = vld [vmem:[%s1301_s3 + $0x128] ss:$28 sps:$4 sm:$0xff]   ;;  %v986_v20 = vld [vmem:[%s1301_s3 + $0xf4] ss:$28 sps:$4 sm:$0xff]  }
  0x11   :  { %522 = vmatpush1.bf16.msra.mxu1 %v947_v34  ;;  %v975_v12 = vld [vmem:[%s1301_s3 + $0x1a0] ss:$28 sps:$4 sm:$0xff]   ;;  %v984_v21 = vld [vmem:[%s1301_s3 + $0xf0] ss:$28 sps:$4 sm:$0xff]   ;;  %v987_v22 = vld [vmem:[%s1301_s3 + $0xf8] ss:$28 sps:$4 sm:$0xff]  }
  0x12   :  { %523 = vmatprep.subr.bf16.mxu1 %v948_v35  ;;  %v978_v14 = vld [vmem:[%s1301_s3 + $0x164] ss:$28 sps:$4 sm:$0xff]   ;;  %v990_v23 = vld [vmem:[%s1301_s3 + $0xbc] ss:$28 sps:$4 sm:$0xff]   ;;  %v999_v31 = vld [vmem:[%s1301_s3 + $0x50] ss:$28 sps:$4 sm:$0xff]  }
  0x13   :  { %559 = vmatpush1.bf16.msra.mxu0 %v932_v25  ;;  %v976_v15 = vld [vmem:[%s1301_s3 + $0x160] ss:$28 sps:$4 sm:$0xff]   ;;  %v988_v24 = vld [vmem:[%s1301_s3 + $0xb8] ss:$28 sps:$4 sm:$0xff]   ;;  %v996_v30 = vld [vmem:[%s1301_s3 + $0x48] ss:$28 sps:$4 sm:$0xff]  }
  0x14   :  { %560 = vmatprep.subr.bf16.mxu0 %v940_v28  ;;  %v991_v25 = vld [vmem:[%s1301_s3 + $0xc0] ss:$28 sps:$4 sm:$0xff]   ;;  %v995_v28 = vld [vmem:[%s1301_s3 + $0x88] ss:$28 sps:$4 sm:$0xff]   ;;  %v1003_v34 = vld [vmem:[%s1301_s3 + $0x18] ss:$28 sps:$4 sm:$0xff]  }
  0x15   :  { %524 = vmatpush1.bf16.msra.mxu1 %v953_v38  ;;  %v994_v26 = vld [vmem:[%s1301_s3 + $0x84] ss:$28 sps:$4 sm:$0xff]   ;;  %v194_v35 = vsub.s32 0, %v1100_v10  ;;  %v198_v38 = vsub.s32 1, %v1100_v10  ;;  %vm793_vm4 = vcmask 1041408   ;;  %vm794_vm5 = vcmask 1043458  }
  0x16   :  { %525 = vmatprep.subr.bf16.mxu1 %v954_v39  ;;  %v992_v27 = vld [vmem:[%s1301_s3 + $0x80] ss:$28 sps:$4 sm:$0xff]   ;;  %v206_v39 = vsub.s32 3, %v1100_v10  ;;  %vm795_vm6 = vmor %vm794_vm5, %vm793_vm4  ;;  %vm796_vm7 = vcmask 128004  }
  0x17   :  { %561 = vmatpush1.bf16.msra.mxu0 %v938_v29  ;;  %v998_v29 = vld [vmem:[%s1301_s3 + $0x4c] ss:$28 sps:$4 sm:$0xff]   ;;  %vm797_vm8 = vmor %vm796_vm7, %vm795_vm6 }
  0x18   :  { %562 = vmatprep.subr.bf16.mxu0 %v946_v32  ;;  %v1002_v32 = vld [vmem:[%s1301_s3 + $0x14] ss:$28 sps:$4 sm:$0xff]  }
  0x19   :  { %526 = vmatpush1.bf16.msra.mxu1 %v959_v42 }
  0x1a   :  { %527 = vmatprep.subr.bf16.mxu1 %v960_v43 }
  0x1b   :  { %563 = vmatpush1.bf16.msra.mxu0 %v944_v33  ;;  %v1000_v33 = vld [vmem:[%s1301_s3 + $0x10] ss:$28 sps:$4 sm:$0xff]  }
  0x1c   :  { %564 = vmatprep.subr.bf16.mxu0 %v952_v36  ;;  %v202_v36 = vsub.s32 2, %v1100_v10 }
  0x1d   :  { %528 = vmatpush1.bf16.msra.mxu1 %v965_v46 }
  0x1e   :  { %529 = vmatprep.subr.bf16.mxu1 %v966_v47 }
  0x1f   :  { %565 = vmatpush1.bf16.msra.mxu0 %v950_v37  ;;  %v190_v37 = vld [vmem:[%s1302_s4] sm:$0x7f] }
  0x20   :  { %566 = vmatprep.subr.bf16.mxu0 %v958_v40  ;;  %v195_v40 = vrot.slane %v190_v37, %v194_v35  ;;  %v199_v42 = vrot.slane %v190_v37, %v198_v38 }
  0x21   :  { %530 = vmatpush1.bf16.msra.mxu1 %v971_v50 }
  0x22   :  { %597 = vmatprep.subr.bf16.mxu1 %v974_v51 }
  0x23   :  { %567 = vmatpush1.bf16.msra.mxu0 %v956_v41  ;;  %v203_v41 = vrot.slane %v190_v37, %v202_v36 }
  0x24   :  { %568 = vmatprep.subr.bf16.mxu0 %v964_v44 }
  0x27   :  { %569 = vmatpush1.bf16.msra.mxu0 %v962_v45 }
  0x28   :  { %570 = vmatprep.subr.bf16.mxu0 %v970_v48 }
  0x2b   :  { %571 = vmatpush1.bf16.msra.mxu0 %v968_v49 }
  0x2c   :  { %896 = vmatprep.subr.bf16.mxu0 %v1044_v2 }
  0xce   :  { %v104_v54 = vpop.f32.mrf.mxu0 }
  0xcf   :  { %v105_v55 = vadd.f32 %v821_v53, %v104_v54 }
  0xd0   :  { %v894_v56 = vpop.f32.mrf.mxu0 }
  0xd1   :  { %v111_v57 = vand.u32 2147483647, %v105_v55  ;;  %v110_v7 = vmax.f32 %v105_v55, 0.0 }
  0xd2   :  { %v107_v58 = vpop.f32.mrf.mxu0 }
  0xd3   :  { %v112_v59 = vsub.f32 0.0, %v111_v57 }
  0xd4   :  { %v895_v60 = vpop.f32.mrf.mxu0 }
  0xd5   :  { %v113_v61 = vmul.f32 1.442695, %v112_v59  ;;  %v1048_v59 = vmov 1983009808  }
  0xd6   :  { %v718_v60 = vunpack.c.l.s4 %v1048_v59 }
  0xd7   :  { %1004 = vpow2.f32 %v113_v61 }
  0xe4   :  { %v1005_v62 = vpop.eup %1004 }
  0xe5   :  { %v115_v63 = vadd.f32 1.0, %v1005_v62  ;;  %v118_v0 = vmul.f32 -0.5, %v1005_v62  ;;  %v121_v3 = vand.u32 2147483647, %v1005_v62 }
  0xe7   :  { %1006 = vlog2.f32 %v115_v63  ;;  %v119_v1 = vadd.f32 1.0, %v118_v0  ;;  %vm122_vm3 = vcmp.lt.f32.partialorder %v121_v3, 0.0004427343  ;;  %v719_v0 = vunpack.c.0.s8 %v718_v60 }
  0xe9   :  { %v120_v6 = vmul.f32 %v1005_v62, %v119_v1 }
  0xf4   :  { %v1007_v4 = vpop.eup %1006 }
  0xf5   :  { %v117_v5 = vmul.f32 0.6931472, %v1007_v4 }
  0xf7   :  { %v123_v8 = vsel %vm122_vm3, %v120_v6, %v117_v5 }
  0xf8   :  { %v124_v9 = vadd.f32 %v123_v8, %v110_v7 }
  0xfa   :  { %v125_v13 = vpack.c.bf16 %v124_v9, %v124_v9  ;;  %v722_v9 = vsub.s32 %v719_v0, %v1100_v10 }
  0xfc   :  { %548 = vmatmul.mubr.bf16.vlgmr.msra.gmra.mxu1 %v125_v13  ;;  %589 = vmatmul.mubr.bf16.vlgmr.msra.gmra.mxu0 %v125_v13 }
  0xfd   :  { %598 = vmatpush1.bf16.msra.mxu1 %v972_v11  ;;  %897 = vmatpush3.bf16.msra.mxu0 %v975_v12 }
  0xfe   :  { %599 = vmatprep.subr.bf16.mxu1 %v978_v14  ;;  %898 = vmatprep.subr.bf16.mxu0 %v1044_v2 }
  0xff   :  { %629 = vmatprep.mubr.bf16.mxu1 %v1047_v52  ;;  %912 = vmatprep.mubr.msk.bf16.mxu0 %vm1045_vm1, %v1044_v2 }
 0x101   :  { %600 = vmatpush1.bf16.msra.mxu1 %v976_v15  ;;  %899 = vmatpush3.bf16.msra.mxu0 %v979_v16  ;;  %v210_v15 = vsub.s32 4, %v1100_v10  ;;  %v218_v16 = vsub.s32 6, %v1100_v10 }
 0x102   :  { %601 = vmatprep.subr.bf16.mxu1 %v982_v17  ;;  %900 = vmatprep.subr.bf16.mxu0 %v1044_v2 }
 0x105   :  { %602 = vmatpush1.bf16.msra.mxu1 %v980_v18  ;;  %901 = vmatpush3.bf16.msra.mxu0 %v983_v19 }
 0x106   :  { %603 = vmatprep.subr.bf16.mxu1 %v986_v20  ;;  %902 = vmatprep.subr.bf16.mxu0 %v1044_v2 }
 0x109   :  { %604 = vmatpush1.bf16.msra.mxu1 %v984_v21  ;;  %903 = vmatpush3.bf16.msra.mxu0 %v987_v22  ;;  %v214_v21 = vsub.s32 5, %v1100_v10 }
 0x10a   :  { %605 = vmatprep.subr.bf16.mxu1 %v990_v23  ;;  %904 = vmatprep.subr.bf16.mxu0 %v1044_v2 }
 0x10d   :  { %606 = vmatpush1.bf16.msra.mxu1 %v988_v24  ;;  %905 = vmatpush3.bf16.msra.mxu0 %v991_v25  ;;  %v211_v24 = vrot.slane %v190_v37, %v210_v15  ;;  %v219_v25 = vrot.slane %v190_v37, %v218_v16 }
 0x10e   :  { %607 = vmatprep.subr.bf16.mxu1 %v994_v26  ;;  %906 = vmatprep.subr.bf16.mxu0 %v1044_v2 }
 0x111   :  { %608 = vmatpush1.bf16.msra.mxu1 %v992_v27  ;;  %907 = vmatpush3.bf16.msra.mxu0 %v995_v28 }
 0x112   :  { %609 = vmatprep.subr.bf16.mxu1 %v998_v29  ;;  %908 = vmatprep.subr.bf16.mxu0 %v1044_v2 }
 0x115   :  { %610 = vmatpush1.bf16.msra.mxu1 %v996_v30  ;;  %909 = vmatpush3.bf16.msra.mxu0 %v999_v31  ;;  %v215_v30 = vrot.slane %v190_v37, %v214_v21 }
 0x116   :  { %611 = vmatprep.subr.bf16.mxu1 %v1002_v32  ;;  %910 = vmatprep.subr.bf16.mxu0 %v1044_v2  ;;  %v207_v2 = vrot.slane %v190_v37, %v206_v39 }
 0x119   :  { %612 = vmatpush1.bf16.msra.mxu1 %v1000_v33  ;;  %911 = vmatpush3.bf16.msra.mxu0 %v1003_v34 }
 0x11c   :  { %630 = vmatmul.mubr.bf16.vlgmr.msra.gmra.mxu1 %v125_v13  ;;  %913 = vmatmul.mubr.bf16.vlgmr.msra.gmra.mxu0 %v125_v13 }
 0x1bc   :  { %v549_v43 = vpop.f32.mrf.mxu1  ;;  %v590_v44 = vpop.f32.mrf.mxu0 }
 0x1bd   :  { %v550_v45 = vadd.f32 %v549_v43, %v195_v40  ;;  %v591_v46 = vadd.f32 %v590_v44, %v203_v41 }
 0x1be   :  { %v551_v47 = vpop.f32.mrf.mxu1  ;;  %v592_v48 = vpop.f32.mrf.mxu0 }
 0x1bf   :  { %v678_v49 = vmul.f32 0.5, %v550_v45  ;;  %v680_v50 = vmul.f32 0.5, %v591_v46  ;;  %v552_v51 = vadd.f32 %v551_v47, %v199_v42  ;;  %v593_v52 = vadd.f32 %v592_v48, %v207_v2 }
 0x1c0   :  { %v553_v53 = vpop.f32.mrf.mxu1  ;;  %v594_v54 = vpop.f32.mrf.mxu0 }
 0x1c1   :  { %1008 = vtanh.f32 %v678_v49  ;;  %v679_v55 = vmul.f32 0.5, %v552_v51  ;;  %v681_v56 = vmul.f32 0.5, %v593_v52 }
 0x1c2   :  { %1010 = vtanh.f32 %v680_v50  ;;  %v554_v57 = vpop.f32.mrf.mxu1  ;;  %v595_v58 = vpop.f32.mrf.mxu0 }
 0x1c3   :  { %1012 = vtanh.f32 %v679_v55 }
 0x1c4   :  { %1014 = vtanh.f32 %v681_v56 }
 0x1ce   :  { %v1009_v61 = vpop.eup %1008 }
 0x1cf   :  { %v1011_v62 = vpop.eup %1010  ;;  %v692_v63 = vadd.f32 1.0, %v1009_v61 }
 0x1d0   :  { %v1013_v1 = vpop.eup %1012  ;;  %v694_v3 = vadd.f32 1.0, %v1011_v62 }
 0x1d1   :  { %v1015_v4 = vpop.eup %1014  ;;  %v693_v5 = vadd.f32 1.0, %v1013_v1  ;;  %v699_v7 = vmul.f32 0.5, %v692_v63 }
 0x1d2   :  { %v695_v6 = vadd.f32 1.0, %v1015_v4  ;;  %v701_v11 = vmul.f32 0.5, %v694_v3 }
 0x1d3   :  { %v700_v8 = vmul.f32 0.5, %v693_v5 }
 0x1d4   :  { %v702_v12 = vmul.f32 0.5, %v695_v6 }
 0x1d5   :  { %v713_v13 = vcombine.low %v699_v7, %v700_v8  ;;  %v714_v14 = vcombine.high %v699_v7, %v700_v8 }
 0x1d6   :  { %v715_v17 = vcombine.low %v701_v11, %v702_v12  ;;  %v716_v18 = vcombine.high %v701_v11, %v702_v12 }
 0x1d7   :  { %v723_v19 = vrot.slane %v713_v13, %v722_v9  ;;  %v730_v20 = vrot.slane %v714_v14, %v722_v9 }
 0x1d8   :  { %v737_v22 = vrot.slane %v715_v17, %v722_v9  ;;  %v744_v23 = vrot.slane %v716_v18, %v722_v9 }
 0x1da   :  { %v745_v26 = vcombine.low %v723_v19, %v737_v22  ;;  %v746_v27 = vcombine.high %v723_v19, %v737_v22  ;;  %v747_v28 = vcombine.low %v730_v20, %v744_v23  ;;  %v748_v29 = vcombine.high %v730_v20, %v744_v23 }
 0x1dc   :  { %792 = vst [vmem:[#allocation2] sm:$0xff] %v745_v26  ;;  %799 = vst [vmem:[#allocation2 + $0xe] sm:$0xff] %v746_v27  ;;  %v631_v31 = vpop.f32.mrf.mxu1  ;;  %v672_v32 = vpop.f32.mrf.mxu0 }
 0x1dd   :  { %801 = vst [vmem:[#allocation2 + $0x1c] sm:$0xff] %v747_v28  ;;  %803 = vst [vmem:[#allocation2 + $0x2a] sm:$0xff] %v748_v29  ;;  %v632_v33 = vadd.f32 %v631_v31, %v211_v24  ;;  %v673_v34 = vadd.f32 %v672_v32, %v219_v25 }
 0x1de   :  { %v633_v35 = vpop.f32.mrf.mxu1  ;;  %v914_v36 = vpop.f32.mrf.mxu0 }
 0x1df   :  { %v682_v10 = vmul.f32 0.5, %v632_v33  ;;  %v684_v38 = vmul.f32 0.5, %v673_v34  ;;  %v634_v39 = vadd.f32 %v633_v35, %v215_v30 }
 0x1e0   :  { %v635_v40 = vpop.f32.mrf.mxu1  ;;  %v675_v41 = vpop.f32.mrf.mxu0 }
 0x1e1   :  { %1016 = vtanh.f32 %v682_v10  ;;  %v683_v42 = vmul.f32 0.5, %v634_v39 }
 0x1e2   :  { %1018 = vtanh.f32 %v684_v38  ;;  %v636_v2 = vpop.f32.mrf.mxu1  ;;  %v915_v37 = vpop.f32.mrf.mxu0 }
 0x1e3   :  { %1020 = vtanh.f32 %v683_v42 }
 0x1ee   :  { %v1017_v43 = vpop.eup %1016 }
 0x1ef   :  { %v1019_v44 = vpop.eup %1018  ;;  %v696_v45 = vadd.f32 1.0, %v1017_v43 }
 0x1f0   :  { %v1021_v46 = vpop.eup %1020  ;;  %v698_v47 = vadd.f32 1.0, %v1019_v44 }
 0x1f1   :  { %v697_v48 = vadd.f32 1.0, %v1021_v46  ;;  %v703_v50 = vmul.f32 0.5, %v696_v45 }
 0x1f2   :  { %v705_v49 = vmul.f32 0.5, %v698_v47 }
 0x1f3   :  { %v704_v51 = vmul.f32 0.5, %v697_v48 }
 0x1f4   :  { %v751_v52 = vcombine.high %v705_v49, %v705_v49  ;;  %v772_v55 = vrot.slane %v705_v49, %v722_v9 }
 0x1f5   :  { %v749_v53 = vcombine.low %v703_v50, %v704_v51  ;;  %v750_v54 = vcombine.high %v703_v50, %v704_v51 }
 0x1f6   :  { %v779_v56 = vrot.slane %v751_v52, %v722_v9 }
 0x1f7   :  { %v758_v57 = vrot.slane %v749_v53, %v722_v9  ;;  %v765_v58 = vrot.slane %v750_v54, %v722_v9 }
 0x1f9   :  { %v780_v59 = vcombine.low %v758_v57, %v772_v55  ;;  %v781_v60 = vcombine.high %v758_v57, %v772_v55  ;;  %v782_v61 = vcombine.low %v765_v58, %v779_v56  ;;  %v783_v62 = vcombine.high %v765_v58, %v779_v56 }
 0x1fb   :  { %798 = vst.msk [vmem:[#allocation2 + $0x8] sm:$0x3f] %vm797_vm8, %v780_v59  ;;  %800 = vst.msk [vmem:[#allocation2 + $0x16] sm:$0x3f] %vm797_vm8, %v781_v60 }
 0x1fc   :  { %802 = vst.msk [vmem:[#allocation2 + $0x24] sm:$0x3f] %vm797_vm8, %v782_v61  ;;  %804 = vst.msk [vmem:[#allocation2 + $0x32] sm:$0x3f] %vm797_vm8, %v783_v62 }
 0x1fd   :  { %809 = vsyncadd [#allocation3], 672  ;;  %s1049_s3 = smov [#allocation2]  }
 0x1fe   :  { %s810_s4 = sshll.u32 %s1049_s3, 4  ;;  %s811_s4 = int_to_ptr.vmem [resolvable:$true] %s810_s4 }
 0x1ff   :  { %s1022_s7 = scalar_lea.vmem %s811_s4, 224  ;;  %s1026_s8 = scalar_lea.vmem %s811_s4, 896 }
 0x200   :  { %p1023_p0 = scmp.ne.s32.totalorder %s811_s4, %s1022_s7  ;;  %p1027_p1 = scmp.lt.s32.totalorder %s811_s4, %s811_s4 }
 0x201   :  { %p1028_p2 = scmp.lt.s32.totalorder %s1026_s8, %s1022_s7 }
 0x203   :  { %p1029_p3 = por %p1028_p2, %p1027_p1 }
 0x205   :  { %p1030_p4 = pnand %p1029_p3, %p1023_p0 }
 0x207   :  { %1033 = shalt.err (!%p1030_p4)
}
 0x208   :  { %s1050_s9 = smov 224   ;;  %s1051_s10 = smov 14  }
 0x209   :  { %816 = dma.vmem_to_hbm [thread:$0]  %s811_s4, 224, %s1303_s5, [#allocation3], %s1050_s9, %s1050_s9, %s1051_s10  }
 0x20a   :  { %1042 = dma.done.wait [#allocation3], 896  }
 0x20b   :  { %1043 = vsyncadd [#allocation3], 4294966400 }
 0x20c   :  { %820 = vsyncpa [#allocation3], 1 }

</bundles_post_ra>
